<compile_context>
chip_gen: v7x
topology: tpu7x:2x2x1
jax: 0.10.0
libtpu: 0.0.40
codegen_flags: <defaults>
</compile_context>

<pallas_src>
import jax
import jax.numpy as jnp
from jax.experimental import pallas as pl
from jax.experimental.pallas import tpu as pltpu


def _relu_tanh_dup_kernel(x_ref, o_ref):
    # x_ref: (B, C*L) float32 in VMEM   (lane-dense rows)
    # o_ref: (B, 2*C*L) float32 in VMEM (final output layout, lane-dense)
    # Activation once on the un-duplicated data, then a single lane-axis
    # concatenate + one full-ref store (no unaligned masked sub-stores).
    t = jnp.tanh(jnp.maximum(x_ref[...], 0.0))
    o_ref[...] = jnp.concatenate([t, t], axis=-1)


def model_forward(x):
    """x: (B, C, L) float32; equivalent to the torch Model.forward."""
    B, C, L = x.shape
    cl = C * L
    # Row-major flatten matches torch's contiguous memory order (glue only;
    # see header comment for why this is not done in-register).
    x2d = x.reshape(B, cl)

    out = pl.pallas_call(
        _relu_tanh_dup_kernel,
        out_shape=jax.ShapeDtypeStruct((B, 2 * cl), x.dtype),
        in_specs=[pl.BlockSpec(memory_space=pltpu.MemorySpace.VMEM)],
        out_specs=pl.BlockSpec(memory_space=pltpu.MemorySpace.VMEM),
    )(x2d)

    # torch hardcodes reshape(2, -1). For the reference shape (B == 2) this is
    # a no-op (same shape, no copy); it also keeps exact torch semantics if B
    # ever differs from 2.
    return out.reshape(2, -1)


def _reference(x):
    # Pure-JAX reference mirroring the torch ops exactly.
    y = jnp.concatenate([x, x], axis=1)            # (2, 6, 4)
    y = jnp.tanh(jnp.maximum(y, 0.0))
    y = y.reshape(-1, 1, y.shape[1])               # view(-1, 1, 6) -> (8, 1, 6)
    y = jnp.transpose(y, (1, 0, 2))                # (1, 8, 6)
    y = y.reshape(2, -1)                           # (2, 24)
    return y


if __name__ == "__main__":
    key = jax.random.PRNGKey(0)
    x = jax.random.normal(key, (2, 3, 4), dtype=jnp.float32)

    out = model_forward(x)
    out = jax.block_until_ready(out)

    ref = _reference(x)
    assert out.shape == (2, 24), out.shape
    assert jnp.allclose(out, ref, atol=1e-6, rtol=1e-6), "mismatch vs reference"

    print("KERNEL_OK")
</pallas_src>

<mosaic_0001>
module attributes {stable_mosaic.version = 11 : i64} {
  func.func @_relu_tanh_dup_kernel(%arg0: memref<2x12xf32, #tpu.memory_space<vmem>>, %arg1: memref<2x24xf32, #tpu.memory_space<vmem>>) attributes {dimension_semantics = [], scalar_prefetch = 0 : i64, scratch_operands = 0 : i64, tpu.core_type = #tpu.core_type<tc>} {
    %c0 = arith.constant 0 : index
    %c0_0 = arith.constant 0 : index
    %0 = vector.load %arg0[%c0, %c0_0] : memref<2x12xf32, #tpu.memory_space<vmem>>, vector<2x12xf32>
    %cst = arith.constant 0.000000e+00 : f32
    %1 = vector.broadcast %cst : f32 to vector<2x12xf32>
    %2 = arith.maximumf %0, %1 : vector<2x12xf32>
    %3 = math.tanh %2 : vector<2x12xf32>
    %4 = tpu.concatenate %3, %3 in 1 : vector<2x12xf32>, vector<2x12xf32> -> vector<2x24xf32>
    %c0_1 = arith.constant 0 : index
    %c0_2 = arith.constant 0 : index
    %5 = vector.load %arg1[%c0_1, %c0_2] : memref<2x24xf32, #tpu.memory_space<vmem>>, vector<2x24xf32>
    tpu.vector_store %arg1[%c0_1, %c0_2], %4 {strides = array<i32>} : memref<2x24xf32, #tpu.memory_space<vmem>>, vector<2x24xf32>,
    return
  }
}

</mosaic_0001>

<bundles_post_ra>
// kernel: tpu_custom_call.1
= control target key start
LH: loop header
LB: loop body
LE: loop exit
PB: predicated region body
PF: predicated region fallthrough
CT: control target
= control target key end

     0   :  { %6 = vsyncpa [#allocation3], 0  ;;  %s137_s0 = inlined_call_operand.hbm [shape: f32[2,12], index: 0, kind: input, shape index: {}]   ;;  %s138_s1 = inlined_call_operand.hbm [shape: f32[2,24], index: 1, kind: output, shape index: {}]  }
   0x1   :  { %7 = vsyncpa [#allocation4], 0  ;;  %s100_s6 = smov [#allocation2]   ;;  %s52_s10 = scalar_lea.hbm %s137_s0, 32 }
   0x2   :  { %s14_s7 = sshll.u32 %s100_s6, 4  ;;  %p53_p0 = scmp.ne.s32.totalorder %s137_s0, %s52_s10  ;;  %s15_s7 = int_to_ptr.vmem [resolvable:$true] %s14_s7 }
   0x3   :  { %p56_p1 = scmp.lt.u32.totalorder %s52_s10, %s137_s0 }
   0x5   :  { %p58_p2 = pnand %p56_p1, %p53_p0 }
   0x7   :  { %61 = shalt.err (!%p58_p2)
}
   0x8   :  { %s62_s15 = scalar_lea.vmem %s15_s7, 32  ;;  %p67_p4 = scmp.lt.s32.totalorder %s15_s7, %s15_s7 }
   0x9   :  { %p63_p3 = scmp.ne.s32.totalorder %s15_s7, %s62_s15  ;;  %p68_p5 = scmp.lt.s32.totalorder %s62_s15, %s62_s15 }
   0xb   :  { %p69_p6 = por %p68_p5, %p67_p4 }
   0xd   :  { %p70_p7 = pnand %p69_p6, %p63_p3 }
   0xf   :  { %73 = shalt.err (!%p70_p7)
}
  0x10   :  { %17 = dma.hbm_to_vmem [thread:$0]  %s137_s0, 32, %s15_s7, [#allocation3]  }
  0x11   :  { %96 = dma.done.wait [#allocation3], 32  }
  0x12   :  { %97 = vsyncadd [#allocation3], 4294967264  ;;  %v21_v0 = vld [vmem:[#allocation2] sm:$0x3]  ;;  %s101_s18 = smov 12   ;;  %s102_s19 = smov [#allocation5]  }
  0x13   :  { %v22_v1 = vmax.f32 %v21_v0, 0.0  ;;  %s38_s20 = sshll.u32 %s102_s19, 4  ;;  %vm28_vm0 = vcmask 97280   ;;  %vm30_vm1 = vcmask 189440   ;;  %s39_s20 = int_to_ptr.vmem [resolvable:$true] %s38_s20 }
  0x14   :  { %s74_s21 = scalar_lea.vmem %s39_s20, 32  ;;  %p79_p9 = scmp.lt.s32.totalorder %s39_s20, %s39_s20 }
  0x15   :  { %50 = vtanh.f32 %v22_v1  ;;  %p75_p8 = scmp.ne.s32.totalorder %s39_s20, %s74_s21  ;;  %p80_p10 = scmp.lt.s32.totalorder %s74_s21, %s74_s21 }
  0x17   :  { %p81_p11 = por %p80_p10, %p79_p9 }
  0x19   :  { %p82_p12 = pnand %p81_p11, %p75_p8 }
  0x1f   :  { %v51_v2 = vpop.eup %50 }
  0x20   :  { %25 = vrot.lane.b32.xlu0 %v51_v2, %s101_s18 }
  0x92   :  { %v26_v3 = vpop.permute.xlu0 %25 }
  0x93   :  { %v29_v4 = vsel %vm28_vm0, %v51_v2, %v26_v3 }
  0x94   :  { %31 = vst.msk [vmem:[#allocation5] sm:$0x3] %vm30_vm1, %v29_v4 }
  0x95   :  { %85 = shalt.err (!%p82_p12)
}
  0x96   :  { %s86_s23 = scalar_lea.hbm %s138_s1, 32 }
  0x97   :  { %p87_p13 = scmp.ne.s32.totalorder %s138_s1, %s86_s23  ;;  %p90_p0 = scmp.lt.u32.totalorder %s86_s23, %s138_s1 }
  0x99   :  { %p92_p1 = pnand %p90_p0, %p87_p13 }
  0x9b   :  { %95 = shalt.err (!%p92_p1)
}
  0x9c   :  { %41 = dma.vmem_to_hbm [thread:$0]  %s39_s20, 32, %s138_s1, [#allocation4]  }
  0x9d   :  { %98 = dma.done.wait [#allocation4], 32  }
  0x9e   :  { %99 = vsyncadd [#allocation4], 4294967264 }
  0x9f   :  { %45 = vsyncpa [#allocation3], 1 }
  0xa0   :  { %46 = vsyncpa [#allocation4], 1 }

</bundles_post_ra>
